<compile_context>
chip_gen: v5e
topology: v5e:2x2
jax: 0.10.0
libtpu: 0.0.40
codegen_flags: <defaults>
</compile_context>

<pallas_src>
import jax
import jax.numpy as jnp
from jax.experimental import pallas as pl
from jax.experimental.pallas import tpu as pltpu


NEG_SLOPE = 0.01  # F.leaky_relu default


def _leaky_relu(v):
    return jnp.where(v > 0, v, NEG_SLOPE * v)


def mlp_kernel(x_ref, w1_ref, b1_ref, w2_ref, b2_ref, o_ref):
    # x:  (TM, F) f32      w1: (F, H) f32      b1: (1, H) f32
    # w2: (1, H)  f32      b2: (1, 1) f32 (SMEM scalar)
    # o:  (TM, 1) f32

    # Hidden layer on the MXU with f32 accumulation. (The kernel is
    # HBM/overhead-bound at these shapes, so f32 MXU costs nothing and keeps
    # bit-close parity with the torch f32 forward.)
    h = jnp.dot(x_ref[...], w1_ref[...], preferred_element_type=jnp.float32)
    h = _leaky_relu(h + b1_ref[...])                      # f32 elementwise (VPU)

    # Output layer: N=1 matmul replaced by VPU multiply + lane reduce (XLU).
    # keepdims=True keeps the natural sublane-major (TM, 1) layout so the
    # store needs no relayout.
    y = jnp.sum(h * w2_ref[...], axis=-1, keepdims=True)  # (TM, 1) f32
    y = _leaky_relu(y + b2_ref[0, 0])                     # scalar bias from SMEM

    o_ref[...] = y.astype(o_ref.dtype)


def _round_up(v, m):
    return ((v + m - 1) // m) * m


def _choose_tm(B, tm_cap):
    """Pick the batch tile size.

    - Small B: a single full-array block (legal for any B, no (8,128) issue).
    - Large B: multiples of 128, capped at tm_cap, and split so the grid has
      at least 2 steps (lets v7x's two TensorCores both work and gives the
      auto-pipeline something to overlap).
    """
    if B <= 256:
        return B
    tm = min(tm_cap, _round_up(pl.cdiv(B, 2), 128))
    return max(tm, 128)


def network_forward(x, w1, b1, w2, b2, *, tm=8192):
    """Pallas forward for Network. x: (B, F) float32 -> (B, 1) float32."""
    B, F = x.shape
    H = w1.shape[1]

    x_f32 = x.astype(jnp.float32)
    w1_f32 = w1.astype(jnp.float32)
    b1_2d = b1.reshape(1, H).astype(jnp.float32)
    w2_row = w2.reshape(1, H).astype(jnp.float32)   # (H,1) column -> (1,H) row
    b2_2d = b2.reshape(1, 1).astype(jnp.float32)

    TM = _choose_tm(B, tm)
    grid = (pl.cdiv(B, TM),)

    # Advisory cost hint so XLA overlaps this small kernel with neighbors.
    bytes_accessed = (B * F + F * H + H + H + 1 + B) * 4
    cost = pl.CostEstimate(
        flops=2 * B * F * H + 2 * B * H,
        transcendentals=0,
        bytes_accessed=bytes_accessed,
    )

    out = pl.pallas_call(
        mlp_kernel,
        out_shape=jax.ShapeDtypeStruct((B, 1), jnp.float32),
        grid=grid,
        in_specs=[
            pl.BlockSpec((TM, F), lambda i: (i, 0)),   # x: tiled over rows
            pl.BlockSpec((F, H), lambda i: (0, 0)),    # w1: VMEM-resident
            pl.BlockSpec((1, H), lambda i: (0, 0)),    # b1: VMEM-resident
            pl.BlockSpec((1, H), lambda i: (0, 0)),    # w2 row: resident
            pl.BlockSpec(memory_space=pltpu.MemorySpace.SMEM),  # b2 scalar
        ],
        out_specs=pl.BlockSpec((TM, 1), lambda i: (i, 0)),
        compiler_params=pltpu.CompilerParams(
            dimension_semantics=("parallel",),  # 2 TCs on v7x; harmless elsewhere
        ),
        cost_estimate=cost,
    )(x_f32, w1_f32, b1_2d, w2_row, b2_2d)

    return out


def init_params(key, features, hidden_layer):
    """Deterministic init mimicking torch.nn.Linear (uniform +/- 1/sqrt(fan_in)).

    Weights are stored as (in, out) — the transpose of torch's (out, in).
    """
    k1, k2, k3, k4 = jax.random.split(key, 4)
    bound1 = 1.0 / jnp.sqrt(features)
    bound2 = 1.0 / jnp.sqrt(hidden_layer)
    w1 = jax.random.uniform(k1, (features, hidden_layer), jnp.float32,
                            minval=-bound1, maxval=bound1)
    b1 = jax.random.uniform(k2, (hidden_layer,), jnp.float32,
                            minval=-bound1, maxval=bound1)
    w2 = jax.random.uniform(k3, (hidden_layer, 1), jnp.float32,
                            minval=-bound2, maxval=bound2)
    b2 = jax.random.uniform(k4, (1,), jnp.float32,
                            minval=-bound2, maxval=bound2)
    return w1, b1, w2, b2


if __name__ == "__main__":
    key = jax.random.PRNGKey(0)
    kx, kp = jax.random.split(key)

    batch = 8
    features = 16
    hidden_layer = 32

    x = jax.random.normal(kx, (batch, features), dtype=jnp.float32)
    w1, b1, w2, b2 = init_params(kp, features, hidden_layer)

    out = network_forward(x, w1, b1, w2, b2)
    out = jax.block_until_ready(out)

    # Reference check in plain f32 JAX (same math as the PyTorch forward).
    def leaky(v):
        return jnp.where(v > 0, v, NEG_SLOPE * v)
    ref = leaky(leaky(x @ w1 + b1) @ w2 + b2)

    assert out.shape == (batch, 1)
    assert jnp.allclose(out, ref, atol=1e-4, rtol=1e-4)

    print("KERNEL_OK")
</pallas_src>

<mosaic_0001>
module attributes {stable_mosaic.version = 11 : i64} {
  func.func @mlp_kernel(%arg0: i32, %arg1: memref<8x16xf32, #tpu.memory_space<vmem>>, %arg2: memref<16x32xf32, #tpu.memory_space<vmem>>, %arg3: memref<1x32xf32, #tpu.memory_space<vmem>>, %arg4: memref<1x32xf32, #tpu.memory_space<vmem>>, %arg5: memref<1x1xf32, #tpu.memory_space<smem>>, %arg6: memref<8x1xf32, #tpu.memory_space<vmem>>) attributes {dimension_semantics = [#tpu.dimension_semantics<parallel>], iteration_bounds = array<i64: 1>, scalar_prefetch = 0 : i64, scratch_operands = 0 : i64, tpu.core_type = #tpu.core_type<tc>, window_params = [{transform_indices = @transform_0, window_bounds = array<i64: 8, 16>}, {pipeline_mode = #tpu.pipeline_mode<synchronous>, transform_indices = @transform_1, window_bounds = array<i64: 16, 32>}, {pipeline_mode = #tpu.pipeline_mode<synchronous>, transform_indices = @transform_2, window_bounds = array<i64: 1, 32>}, {pipeline_mode = #tpu.pipeline_mode<synchronous>, transform_indices = @transform_3, window_bounds = array<i64: 1, 32>}, {transform_indices = @transform_4, window_bounds = array<i64: 1, 1>}, {transform_indices = @transform_5, window_bounds = array<i64: 8, 1>}]} {
    %c0 = arith.constant 0 : index
    %c0_0 = arith.constant 0 : index
    %0 = vector.load %arg1[%c0, %c0_0] : memref<8x16xf32, #tpu.memory_space<vmem>>, vector<8x16xf32>
    %c0_1 = arith.constant 0 : index
    %c0_2 = arith.constant 0 : index
    %1 = vector.load %arg2[%c0_1, %c0_2] : memref<16x32xf32, #tpu.memory_space<vmem>>, vector<16x32xf32>
    %cst = arith.constant dense<0.000000e+00> : vector<8x32xf32>
    %2 = tpu.matmul %0, %1, %cst {dimension_numbers = #tpu.dot_dimension_numbers<[1], [0], [0], [1], [0, 0, 1, 1], [], []>} : vector<8x16xf32>, vector<16x32xf32>, vector<8x32xf32> -> vector<8x32xf32>
    %c0_3 = arith.constant 0 : index
    %c0_4 = arith.constant 0 : index
    %3 = vector.load %arg3[%c0_3, %c0_4] : memref<1x32xf32, #tpu.memory_space<vmem>>, vector<1x32xf32>
    %4 = vector.broadcast %3 : vector<1x32xf32> to vector<8x32xf32>
    %5 = arith.addf %2, %4 : vector<8x32xf32>
    %cst_5 = arith.constant 0.000000e+00 : f32
    %6 = vector.broadcast %cst_5 : f32 to vector<8x32xf32>
    %7 = arith.cmpf ogt, %5, %6 : vector<8x32xf32>
    %cst_6 = arith.constant 0.00999999977 : f32
    %8 = vector.broadcast %cst_6 : f32 to vector<8x32xf32>
    %9 = arith.mulf %8, %5 : vector<8x32xf32>
    %10 = arith.select %7, %5, %9 : vector<8x32xi1>, vector<8x32xf32>
    %c0_7 = arith.constant 0 : index
    %c0_8 = arith.constant 0 : index
    %11 = vector.load %arg4[%c0_7, %c0_8] : memref<1x32xf32, #tpu.memory_space<vmem>>, vector<1x32xf32>
    %12 = vector.broadcast %11 : vector<1x32xf32> to vector<8x32xf32>
    %13 = arith.mulf %10, %12 : vector<8x32xf32>
    %cst_9 = arith.constant dense<0.000000e+00> : vector<8xf32>
    %14 = vector.multi_reduction <add>, %13, %cst_9 [1] : vector<8x32xf32> to vector<8xf32>
    %15 = vector.shape_cast %14 : vector<8xf32> to vector<8x1xf32>
    %c0_10 = arith.constant 0 : index
    %c0_11 = arith.constant 0 : index
    %16 = memref.load %arg5[%c0_10, %c0_11] : memref<1x1xf32, #tpu.memory_space<smem>>
    %17 = vector.broadcast %16 : f32 to vector<8x1xf32>
    %18 = arith.addf %15, %17 : vector<8x1xf32>
    %cst_12 = arith.constant 0.000000e+00 : f32
    %19 = vector.broadcast %cst_12 : f32 to vector<8x1xf32>
    %20 = arith.cmpf ogt, %18, %19 : vector<8x1xf32>
    %cst_13 = arith.constant 0.00999999977 : f32
    %21 = vector.broadcast %cst_13 : f32 to vector<8x1xf32>
    %22 = arith.mulf %21, %18 : vector<8x1xf32>
    %23 = arith.select %20, %18, %22 : vector<8x1xi1>, vector<8x1xf32>
    %c0_14 = arith.constant 0 : index
    %c0_15 = arith.constant 0 : index
    %24 = vector.load %arg6[%c0_14, %c0_15] : memref<8x1xf32, #tpu.memory_space<vmem>>, vector<8x1xf32>
    tpu.vector_store %arg6[%c0_14, %c0_15], %23 {strides = array<i32>} : memref<8x1xf32, #tpu.memory_space<vmem>>, vector<8x1xf32>,
    return
  }
  func.func @transform_0(%arg0: i32) -> (i32, i32) {
    %c0_i32 = arith.constant 0 : i32
    %c0_i32_0 = arith.constant 0 : i32
    return %arg0, %c0_i32 : i32, i32
  }
  func.func @transform_1(%arg0: i32) -> (i32, i32) {
    %c0_i32 = arith.constant 0 : i32
    %c0_i32_0 = arith.constant 0 : i32
    %c0_i32_1 = arith.constant 0 : i32
    return %c0_i32, %c0_i32_0 : i32, i32
  }
  func.func @transform_2(%arg0: i32) -> (i32, i32) {
    %c0_i32 = arith.constant 0 : i32
    %c0_i32_0 = arith.constant 0 : i32
    %c0_i32_1 = arith.constant 0 : i32
    return %c0_i32, %c0_i32_0 : i32, i32
  }
  func.func @transform_3(%arg0: i32) -> (i32, i32) {
    %c0_i32 = arith.constant 0 : i32
    %c0_i32_0 = arith.constant 0 : i32
    %c0_i32_1 = arith.constant 0 : i32
    return %c0_i32, %c0_i32_0 : i32, i32
  }
  func.func @transform_4(%arg0: i32) -> (i32, i32) {
    %c0_i32 = arith.constant 0 : i32
    %c0_i32_0 = arith.constant 0 : i32
    %c0_i32_1 = arith.constant 0 : i32
    return %c0_i32, %c0_i32_0 : i32, i32
  }
  func.func @transform_5(%arg0: i32) -> (i32, i32) {
    %c0_i32 = arith.constant 0 : i32
    %c0_i32_0 = arith.constant 0 : i32
    return %arg0, %c0_i32 : i32, i32
  }
}

</mosaic_0001>

<bundles_post_ra>
// kernel: tpu_custom_call.1
= control target key start
LH: loop header
LB: loop body
LE: loop exit
PB: predicated region body
PF: predicated region fallthrough
CT: control target
= control target key end

     0   :  { %11 = vsyncpa [#allocation4], 0  ;;  %s219_s0 = inlined_call_operand.hbm [shape: f32[8,16], index: 0, kind: input, shape index: {}]   ;;  %s220_s1 = inlined_call_operand.hbm [shape: f32[16,32], index: 1, kind: input, shape index: {}]   ;;  %s221_s2 = inlined_call_operand.vmem [shape: f32[1,32], index: 2, kind: input, shape index: {}]   ;;  %s222_s3 = inlined_call_operand.vmem [shape: f32[1,32], index: 3, kind: input, shape index: {}]   ;;  %s223_s4 = inlined_call_operand.<no memory space> [shape: f32[1,1], index: 4, kind: input, shape index: {}]   ;;  %s224_s5 = inlined_call_operand.vmem [shape: f32[8,1], index: 5, kind: output, shape index: {}]  }
   0x1   :  { %s18_s20 = sshll.u32 %s219_s0, 4  ;;  %s19_s20 = int_to_ptr.hbm [resolvable:$true] %s18_s20 }
   0x2   :  { %12 = vsyncpa [#allocation6], 0  ;;  %s167_s21 = smov [#allocation3]   ;;  %s28_s25 = sshll.u32 %s220_s1, 4  ;;  %s29_s25 = int_to_ptr.hbm [resolvable:$true] %s28_s25 }
   0x3   :  { %s20_s22 = sshll.u32 %s167_s21, 4  ;;  %s168_s26 = smov [#allocation5]   ;;  %s21_s22 = int_to_ptr.vmem [resolvable:$true] %s20_s22 }
   0x4   :  { %23 = dma.hbm_to_vmem [thread:$0]  %s19_s20, 128, %s21_s22, [#allocation4]  }
   0x5   :  { %s30_s27 = sshll.u32 %s168_s26, 4  ;;  %s169_s28 = smov 128   ;;  %s31_s27 = int_to_ptr.vmem [resolvable:$true] %s30_s27 }
   0x6   :  { %s170_s29 = smov 8  }
   0x7   :  { %36 = dma.hbm_to_vmem [thread:$0]  %s29_s25, 256, %s31_s27, [#allocation6], %s169_s28, %s169_s28, %s170_s29  }
   0x8   :  { %163 = dma.done.wait [#allocation4], 128  }
   0x9   :  { %164 = vsyncadd [#allocation4], 4294967168 }
   0xa   :  { %165 = dma.done.wait [#allocation6], 256  }
   0xb   :  { %166 = vsyncadd [#allocation6], 4294967040  ;;  %v53_v0 = vld [vmem:[#allocation5 + $0x8] sm:$0xff]  ;;  %v52_v1 = vld [vmem:[#allocation5] sm:$0xff]  ;;  %vm58_vm0 = vcmask 130048   ;;  %vm90_vm2 = vcmask 261120   ;;  %v95_v11 = vstv %s223_s4 }
   0xc   :  { %76 = vmatpush.msra.mxu0 %v53_v0  ;;  %v51_v2 = vld [vmem:[#allocation3] sm:$0xff]  ;;  %vm100_vm4 = vcmask 7168  }
   0xd   :  { %v113_v3 = vld [vmem:[%s221_s2] ss:$0 sm:$0xff] }
   0xe   :  { %77 = vmatpush.msra.mxu0 %v52_v1  ;;  %v114_v6 = vld [vmem:[%s222_s3] ss:$0 sm:$0xff] }
   0xf   :  { %108 = vmatmul.msk.f32.vlgmr.msra.gmra.mxu0 %vm58_vm0, %v51_v2 }
  0x8c   :  { %v79_v4 = vpop.f32.mrf.mxu0 }
  0x8d   :  { %v80_v5 = vadd.f32 %v113_v3, %v79_v4 }
  0x8f   :  { %v83_v7 = vmul.f32 0.01, %v80_v5  ;;  %vm82_vm1 = vcmp.gt.f32.partialorder %v80_v5, 0.0 }
  0x91   :  { %v84_v8 = vsel %vm82_vm1, %v80_v5, %v83_v7 }
  0x92   :  { %v89_v9 = vmul.f32 %v114_v6, %v84_v8 }
  0x94   :  { %v91_v10 = vsel %vm90_vm2, %v89_v9, 0.0 }
  0x95   :  { %92 = vadd.xlane.f32.xlu0 %v91_v10 }
 0x108   :  { %v93_v12 = vpop.xlane.xlu0 %92 }
 0x109   :  { %v96_v13 = vadd.f32 %v95_v11, %v93_v12 }
 0x10b   :  { %vm97_vm3 = vcmp.gt.f32.partialorder %v96_v13, 0.0  ;;  %v98_v14 = vmul.f32 0.01, %v96_v13 }
 0x10d   :  { %v99_v15 = vsel %vm97_vm3, %v96_v13, %v98_v14 }
 0x10e   :  { %101 = vst.msk [vmem:[%s224_s5] sm:$0xff] %vm100_vm4, %v99_v15 }
 0x10f   :  { %106 = vsyncpa [#allocation4], 1 }
 0x110   :  { %107 = vsyncpa [#allocation6], 1 }

</bundles_post_ra>
